<compile_context>
chip_gen: v6e
topology: v6e:2x2x1
jax: 0.10.0
libtpu: 0.0.40
codegen_flags: <defaults>
</compile_context>

<pallas_src>
import math

import jax
import jax.numpy as jnp
from jax.experimental import pallas as pl
from jax.experimental.pallas import tpu as pltpu


_LANE = 128          # vreg lane width
_MAX_TB = 16 * 1024  # per-step VMEM ~ 320*TB bytes -> ~5 MiB at 16K; safe on all gens


def mlp_kernel(x_ref, w1_ref, b1_ref, w2_ref, b2_ref,
               w3_ref, b3_ref, w4_ref, b4_ref, o_ref):
    # x_ref: [8, TB] f32 (batch on lanes); wN_ref: [out, in] f32; bN_ref: [out, 1] f32.
    # TODO(synk): on v6e/v7x the 8/24/12/6-wide dots run the 256-wide MXU at <1%
    # utilization; if a bundle dump confirms MXU-cadence bound, a VPU
    # broadcast-MAC lowering of these tiny layers could win further.
    x = x_ref[...]                                                         # [8, TB]

    h1 = jnp.dot(w1_ref[...], x, preferred_element_type=jnp.float32) + b1_ref[...]
    h1 = jnp.maximum(h1, 0.0)                                              # [24, TB]

    h2 = jnp.dot(w2_ref[...], h1, preferred_element_type=jnp.float32) + b2_ref[...]
    h2 = jnp.maximum(h2, 0.0)                                              # [12, TB]

    h3 = jnp.dot(w3_ref[...], h2, preferred_element_type=jnp.float32) + b3_ref[...]
    h3 = jnp.maximum(h3, 0.0)                                              # [6, TB]

    o_ref[...] = (jnp.dot(w4_ref[...], h3, preferred_element_type=jnp.float32)
                  + b4_ref[...])                                           # [1, TB]


def _round_up(x, m):
    return ((x + m - 1) // m) * m


def _choose_tile(B):
    """Batch tile (lanes per grid step)."""
    b128 = _round_up(B, _LANE)
    if b128 <= _LANE:
        return _LANE
    # Aim for >=2 grid steps (v7x megacore) while capping per-step VMEM.
    return min(_MAX_TB, _round_up(-(-b128 // 2), _LANE))


def mlp_forward(x, params):
    """x: [B, 8] float32.  params: wN [out, in] f32, bN [out] f32 (PyTorch layout)."""
    B, F = x.shape
    assert F == 8, F

    TB = _choose_tile(B)
    grid = (pl.cdiv(B, TB),)

    # Single transpose so batch sits on the lane axis; no zero-init / scatter /
    # dtype-cast prepass.  Partial last block is masked on store and discarded.
    # TODO(synk): if upstream can hand over the feature-major [8, B] layout
    # directly, this transpose (the last remaining extra HBM pass) goes away too.
    xt = x.T                                                     # [8, B] f32

    w = [params[f"w{i}"] for i in range(1, 5)]                   # [out, in] f32
    b = [params[f"b{i}"].reshape(-1, 1) for i in range(1, 5)]    # [out, 1]  f32

    def resident_spec(shape):
        # Full-array block + constant index_map -> stays VMEM-resident across
        # all grid steps (weights + biases total < 3 KiB).
        return pl.BlockSpec(shape, lambda i: tuple(0 for _ in shape))

    in_specs = [pl.BlockSpec((8, TB), lambda i: (0, i))]         # batch-tiled input
    in_arrays = [xt]
    for wi, bi in zip(w, b):
        in_specs += [resident_spec(wi.shape), resident_spec(bi.shape)]
        in_arrays += [wi, bi]

    flops = 2 * B * (8 * 24 + 24 * 12 + 12 * 6 + 6 * 1)
    bytes_accessed = (B * 8 * 4                                  # f32 input
                      + B * 1 * 4                                # f32 output
                      + 4 * (24 * 8 + 12 * 24 + 6 * 12 + 1 * 6)  # f32 weights
                      + 4 * (24 + 12 + 6 + 1))                   # f32 biases

    out = pl.pallas_call(
        mlp_kernel,
        out_shape=jax.ShapeDtypeStruct((1, B), jnp.float32),
        grid=grid,
        in_specs=in_specs,
        out_specs=pl.BlockSpec((1, TB), lambda i: (0, i)),       # lane-dense output
        compiler_params=pltpu.CompilerParams(
            dimension_semantics=("parallel",)),
        cost_estimate=pl.CostEstimate(
            flops=flops, transcendentals=0, bytes_accessed=bytes_accessed),
    )(*in_arrays)

    return out.reshape(B, 1)                                     # [1, B] -> [B, 1]


def init_params(key):
    """PyTorch default Linear init: U(-1/sqrt(fan_in), 1/sqrt(fan_in)).
    Weights stored [out, in], biases [out]."""
    dims = [(8, 24), (24, 12), (12, 6), (6, 1)]
    params = {}
    keys = jax.random.split(key, 2 * len(dims))
    for idx, (fan_in, fan_out) in enumerate(dims):
        bound = 1.0 / math.sqrt(fan_in)
        wk, bk = keys[2 * idx], keys[2 * idx + 1]
        params[f"w{idx + 1}"] = jax.random.uniform(
            wk, (fan_out, fan_in), jnp.float32, -bound, bound)
        params[f"b{idx + 1}"] = jax.random.uniform(
            bk, (fan_out,), jnp.float32, -bound, bound)
    return params


def mlp_reference(x, params):
    """Pure-JAX f32 reference (PyTorch semantics)."""
    h = x
    for i in range(1, 4):
        h = jnp.maximum(h @ params[f"w{i}"].T + params[f"b{i}"], 0.0)
    return h @ params["w4"].T + params["b4"]


if __name__ == "__main__":
    key = jax.random.PRNGKey(0)
    pkey, xkey1, xkey2 = jax.random.split(key, 3)

    params = init_params(pkey)

    # batch=16, in_features=8 (small shape consistent with the module).
    x = jax.random.normal(xkey1, (16, 8), dtype=jnp.float32)
    out = jax.block_until_ready(mlp_forward(x, params))
    assert out.shape == (16, 1), out.shape
    assert out.dtype == jnp.float32, out.dtype
    err = float(jnp.max(jnp.abs(out - mlp_reference(x, params))))
    assert err < 5e-2, f"max abs err {err}"

    # Second shape exercising a multi-step grid with a partial last block.
    x2 = jax.random.normal(xkey2, (300, 8), dtype=jnp.float32)
    out2 = jax.block_until_ready(mlp_forward(x2, params))
    assert out2.shape == (300, 1), out2.shape
    err2 = float(jnp.max(jnp.abs(out2 - mlp_reference(x2, params))))
    assert err2 < 5e-2, f"max abs err {err2}"

    print("KERNEL_OK")
</pallas_src>

<mosaic_0001>
module attributes {stable_mosaic.version = 11 : i64} {
  func.func @mlp_kernel(%arg0: i32, %arg1: memref<8x128xf32, #tpu.memory_space<vmem>>, %arg2: memref<24x8xf32, #tpu.memory_space<vmem>>, %arg3: memref<24x1xf32, #tpu.memory_space<vmem>>, %arg4: memref<12x24xf32, #tpu.memory_space<vmem>>, %arg5: memref<12x1xf32, #tpu.memory_space<vmem>>, %arg6: memref<6x12xf32, #tpu.memory_space<vmem>>, %arg7: memref<6x1xf32, #tpu.memory_space<vmem>>, %arg8: memref<1x6xf32, #tpu.memory_space<vmem>>, %arg9: memref<1x1xf32, #tpu.memory_space<vmem>>, %arg10: memref<1x128xf32, #tpu.memory_space<vmem>>) attributes {dimension_semantics = [#tpu.dimension_semantics<parallel>], iteration_bounds = array<i64: 1>, scalar_prefetch = 0 : i64, scratch_operands = 0 : i64, tpu.core_type = #tpu.core_type<tc>, window_params = [{transform_indices = @transform_0, window_bounds = array<i64: 8, 128>}, {pipeline_mode = #tpu.pipeline_mode<synchronous>, transform_indices = @transform_1, window_bounds = array<i64: 24, 8>}, {pipeline_mode = #tpu.pipeline_mode<synchronous>, transform_indices = @transform_2, window_bounds = array<i64: 24, 1>}, {pipeline_mode = #tpu.pipeline_mode<synchronous>, transform_indices = @transform_3, window_bounds = array<i64: 12, 24>}, {pipeline_mode = #tpu.pipeline_mode<synchronous>, transform_indices = @transform_4, window_bounds = array<i64: 12, 1>}, {pipeline_mode = #tpu.pipeline_mode<synchronous>, transform_indices = @transform_5, window_bounds = array<i64: 6, 12>}, {pipeline_mode = #tpu.pipeline_mode<synchronous>, transform_indices = @transform_6, window_bounds = array<i64: 6, 1>}, {pipeline_mode = #tpu.pipeline_mode<synchronous>, transform_indices = @transform_7, window_bounds = array<i64: 1, 6>}, {pipeline_mode = #tpu.pipeline_mode<synchronous>, transform_indices = @transform_8, window_bounds = array<i64: 1, 1>}, {transform_indices = @transform_9, window_bounds = array<i64: 1, 128>}]} {
    %c0 = arith.constant 0 : index
    %c0_0 = arith.constant 0 : index
    %0 = vector.load %arg1[%c0, %c0_0] : memref<8x128xf32, #tpu.memory_space<vmem>>, vector<8x128xf32>
    %c0_1 = arith.constant 0 : index
    %c0_2 = arith.constant 0 : index
    %1 = vector.load %arg2[%c0_1, %c0_2] : memref<24x8xf32, #tpu.memory_space<vmem>>, vector<24x8xf32>
    %cst = arith.constant dense<0.000000e+00> : vector<24x128xf32>
    %2 = tpu.matmul %1, %0, %cst {dimension_numbers = #tpu.dot_dimension_numbers<[1], [0], [0], [1], [0, 0, 1, 1], [], []>} : vector<24x8xf32>, vector<8x128xf32>, vector<24x128xf32> -> vector<24x128xf32>
    %c0_3 = arith.constant 0 : index
    %c0_4 = arith.constant 0 : index
    %3 = vector.load %arg3[%c0_3, %c0_4] : memref<24x1xf32, #tpu.memory_space<vmem>>, vector<24x1xf32>
    %4 = vector.broadcast %3 : vector<24x1xf32> to vector<24x128xf32>
    %5 = arith.addf %2, %4 : vector<24x128xf32>
    %cst_5 = arith.constant 0.000000e+00 : f32
    %6 = vector.broadcast %cst_5 : f32 to vector<24x128xf32>
    %7 = arith.maximumf %5, %6 : vector<24x128xf32>
    %c0_6 = arith.constant 0 : index
    %c0_7 = arith.constant 0 : index
    %8 = vector.load %arg4[%c0_6, %c0_7] : memref<12x24xf32, #tpu.memory_space<vmem>>, vector<12x24xf32>
    %cst_8 = arith.constant dense<0.000000e+00> : vector<12x128xf32>
    %9 = tpu.matmul %8, %7, %cst_8 {dimension_numbers = #tpu.dot_dimension_numbers<[1], [0], [0], [1], [0, 0, 1, 1], [], []>} : vector<12x24xf32>, vector<24x128xf32>, vector<12x128xf32> -> vector<12x128xf32>
    %c0_9 = arith.constant 0 : index
    %c0_10 = arith.constant 0 : index
    %10 = vector.load %arg5[%c0_9, %c0_10] : memref<12x1xf32, #tpu.memory_space<vmem>>, vector<12x1xf32>
    %11 = vector.broadcast %10 : vector<12x1xf32> to vector<12x128xf32>
    %12 = arith.addf %9, %11 : vector<12x128xf32>
    %cst_11 = arith.constant 0.000000e+00 : f32
    %13 = vector.broadcast %cst_11 : f32 to vector<12x128xf32>
    %14 = arith.maximumf %12, %13 : vector<12x128xf32>
    %c0_12 = arith.constant 0 : index
    %c0_13 = arith.constant 0 : index
    %15 = vector.load %arg6[%c0_12, %c0_13] : memref<6x12xf32, #tpu.memory_space<vmem>>, vector<6x12xf32>
    %cst_14 = arith.constant dense<0.000000e+00> : vector<6x128xf32>
    %16 = tpu.matmul %15, %14, %cst_14 {dimension_numbers = #tpu.dot_dimension_numbers<[1], [0], [0], [1], [0, 0, 1, 1], [], []>} : vector<6x12xf32>, vector<12x128xf32>, vector<6x128xf32> -> vector<6x128xf32>
    %c0_15 = arith.constant 0 : index
    %c0_16 = arith.constant 0 : index
    %17 = vector.load %arg7[%c0_15, %c0_16] : memref<6x1xf32, #tpu.memory_space<vmem>>, vector<6x1xf32>
    %18 = vector.broadcast %17 : vector<6x1xf32> to vector<6x128xf32>
    %19 = arith.addf %16, %18 : vector<6x128xf32>
    %cst_17 = arith.constant 0.000000e+00 : f32
    %20 = vector.broadcast %cst_17 : f32 to vector<6x128xf32>
    %21 = arith.maximumf %19, %20 : vector<6x128xf32>
    %c0_18 = arith.constant 0 : index
    %c0_19 = arith.constant 0 : index
    %22 = vector.load %arg8[%c0_18, %c0_19] : memref<1x6xf32, #tpu.memory_space<vmem>>, vector<1x6xf32>
    %cst_20 = arith.constant dense<0.000000e+00> : vector<1x128xf32>
    %23 = tpu.matmul %22, %21, %cst_20 {dimension_numbers = #tpu.dot_dimension_numbers<[1], [0], [0], [1], [0, 0, 1, 1], [], []>} : vector<1x6xf32>, vector<6x128xf32>, vector<1x128xf32> -> vector<1x128xf32>
    %c0_21 = arith.constant 0 : index
    %c0_22 = arith.constant 0 : index
    %24 = vector.load %arg9[%c0_21, %c0_22] : memref<1x1xf32, #tpu.memory_space<vmem>>, vector<1x1xf32>
    %25 = vector.broadcast %24 : vector<1x1xf32> to vector<1x128xf32>
    %26 = arith.addf %23, %25 : vector<1x128xf32>
    %c0_23 = arith.constant 0 : index
    %c0_24 = arith.constant 0 : index
    %27 = vector.load %arg10[%c0_23, %c0_24] : memref<1x128xf32, #tpu.memory_space<vmem>>, vector<1x128xf32>
    tpu.vector_store %arg10[%c0_23, %c0_24], %26 {strides = array<i32>} : memref<1x128xf32, #tpu.memory_space<vmem>>, vector<1x128xf32>,
    return
  }
  func.func @transform_0(%arg0: i32) -> (i32, i32) {
    %c0_i32 = arith.constant 0 : i32
    %c0_i32_0 = arith.constant 0 : i32
    return %c0_i32, %arg0 : i32, i32
  }
  func.func @transform_1(%arg0: i32) -> (i32, i32) {
    %c0_i32 = arith.constant 0 : i32
    %c0_i32_0 = arith.constant 0 : i32
    %c0_i32_1 = arith.constant 0 : i32
    return %c0_i32, %c0_i32_0 : i32, i32
  }
  func.func @transform_2(%arg0: i32) -> (i32, i32) {
    %c0_i32 = arith.constant 0 : i32
    %c0_i32_0 = arith.constant 0 : i32
    %c0_i32_1 = arith.constant 0 : i32
    return %c0_i32, %c0_i32_0 : i32, i32
  }
  func.func @transform_3(%arg0: i32) -> (i32, i32) {
    %c0_i32 = arith.constant 0 : i32
    %c0_i32_0 = arith.constant 0 : i32
    %c0_i32_1 = arith.constant 0 : i32
    return %c0_i32, %c0_i32_0 : i32, i32
  }
  func.func @transform_4(%arg0: i32) -> (i32, i32) {
    %c0_i32 = arith.constant 0 : i32
    %c0_i32_0 = arith.constant 0 : i32
    %c0_i32_1 = arith.constant 0 : i32
    return %c0_i32, %c0_i32_0 : i32, i32
  }
  func.func @transform_5(%arg0: i32) -> (i32, i32) {
    %c0_i32 = arith.constant 0 : i32
    %c0_i32_0 = arith.constant 0 : i32
    %c0_i32_1 = arith.constant 0 : i32
    return %c0_i32, %c0_i32_0 : i32, i32
  }
  func.func @transform_6(%arg0: i32) -> (i32, i32) {
    %c0_i32 = arith.constant 0 : i32
    %c0_i32_0 = arith.constant 0 : i32
    %c0_i32_1 = arith.constant 0 : i32
    return %c0_i32, %c0_i32_0 : i32, i32
  }
  func.func @transform_7(%arg0: i32) -> (i32, i32) {
    %c0_i32 = arith.constant 0 : i32
    %c0_i32_0 = arith.constant 0 : i32
    %c0_i32_1 = arith.constant 0 : i32
    return %c0_i32, %c0_i32_0 : i32, i32
  }
  func.func @transform_8(%arg0: i32) -> (i32, i32) {
    %c0_i32 = arith.constant 0 : i32
    %c0_i32_0 = arith.constant 0 : i32
    %c0_i32_1 = arith.constant 0 : i32
    return %c0_i32, %c0_i32_0 : i32, i32
  }
  func.func @transform_9(%arg0: i32) -> (i32, i32) {
    %c0_i32 = arith.constant 0 : i32
    %c0_i32_0 = arith.constant 0 : i32
    return %c0_i32, %arg0 : i32, i32
  }
}

</mosaic_0001>

<bundles_post_ra>
// kernel: tpu_custom_call.1
= control target key start
LH: loop header
LB: loop body
LE: loop exit
PB: predicated region body
PF: predicated region fallthrough
CT: control target
= control target key end

     0   :  { %s642_s0 = inlined_call_operand.vmem [shape: f32[8,16], index: 0, kind: input, shape index: {}]   ;;  %s643_s1 = inlined_call_operand.vmem [shape: f32[24,8], index: 1, kind: input, shape index: {}]   ;;  %s644_s2 = inlined_call_operand.vmem [shape: f32[24,1], index: 2, kind: input, shape index: {}]   ;;  %s645_s3 = inlined_call_operand.vmem [shape: f32[12,24], index: 3, kind: input, shape index: {}]   ;;  %s646_s4 = inlined_call_operand.vmem [shape: f32[12,1], index: 4, kind: input, shape index: {}]   ;;  %s647_s5 = inlined_call_operand.vmem [shape: f32[6,12], index: 5, kind: input, shape index: {}]   ;;  %s648_s6 = inlined_call_operand.vmem [shape: f32[6,1], index: 6, kind: input, shape index: {}]   ;;  %s649_s7 = inlined_call_operand.vmem [shape: f32[1,6], index: 7, kind: input, shape index: {}]   ;;  %s650_s8 = inlined_call_operand.<no memory space> [shape: f32[1,1], index: 8, kind: input, shape index: {}]   ;;  %s651_s9 = inlined_call_operand.hbm [shape: f32[1,16], index: 9, kind: output, shape index: {}]  }
   0x1   :  { %v14_v0 = vstv %s650_s8 }
   0x2   :  { %15 = vst [vmem:[#allocation2] sm:$0x1] %v14_v0 }
   0x3   :  { %v35_v1 = vld [vmem:[%s642_s0] sm:$0xff]  ;;  %vm57_vm0 = vcmask 64512   ;;  %v521_v3 = vmov 0.0   ;;  %vm522_vm1 = vmmov 0   ;;  %v41_v4 = vld [vmem:[%s644_s2 + $0x10] sm:$0xff]  ;;  %v523_v5 = vmov 0  }
   0x4   :  { %v36_v2 = vld [vmem:[%s643_s1] sm:$0xff]  ;;  %461 = vmatprep.subr.mxu0 %v521_v3  ;;  %463 = vmatprep.mubr.msk.f32.mxu0 %vm522_vm1, %v521_v3 }
   0x5   :  { %462 = vmatpush3.msra.mxu0 %v35_v1  ;;  %497 = vset.pattern.permute.xlu0 %v523_v5  ;;  %v39_v6 = vld [vmem:[%s644_s2] sm:$0xff] }
   0x6   :  { %464 = vmatmul.mubr.msk.f32.vlgmr.msra.gmra.mxu0 %vm57_vm0, %v36_v2  ;;  %54 = vperm.xlu0 %497, %v41_v4  }
   0x7   :  { %16 = vsyncpa [#allocation4], 0  ;;  %466 = vmatprep.mubr.msk.f32.mxu0 %vm522_vm1, %v521_v3  ;;  %v37_v7 = vld [vmem:[%s643_s1 + $0x8] sm:$0xff]  ;;  %498 = vset.pattern.permute.xlu1 %v523_v5  ;;  %v38_v10 = vld [vmem:[%s643_s1 + $0x10] sm:$0xff]  ;;  %vm164_vm2 = vcmask 195584   ;;  %vm259_vm3 = vcmask 1043456   ;;  %v341_v46 = vlaneseq }
   0x8   :  { %v40_v8 = vld [vmem:[%s644_s2 + $0x8] sm:$0xff]  ;;  %44 = vperm.xlu1 %498, %v39_v6   ;;  %488 = vmatprep.subr.mxu0 %v521_v3  ;;  %v152_v11 = vld [vmem:[%s646_s4] sm:$0xff]  ;;  %vm255_vm4 = vcmask 97280   ;;  %vm349_vm5 = vcmask 1045504   ;;  %vm345_vm6 = vcmask 48128  }
   0x9   :  { %v153_v9 = vld [vmem:[%s646_s4 + $0x8] sm:$0xf]  ;;  %v249_v12 = vld [vmem:[%s648_s6] sm:$0x3f]  ;;  %v342_v47 = vshrl.u32 %v341_v46, 7 }
   0xa   :  { %467 = vmatmul.mubr.msk.f32.gmra.mxu0 %vm57_vm0, %v37_v7  ;;  %49 = vperm.xlu0 %497, %v40_v8   ;;  %v335_v13 = vld [vmem:[#allocation2] sm:$0x1]  ;;  %v151_v30 = vld [vmem:[%s645_s3 + $0x8] sm:$0xf] }
   0xb   :  { %469 = vmatprep.mubr.msk.f32.mxu0 %vm522_vm1, %v521_v3  ;;  %v150_v14 = vld [vmem:[%s645_s3] sm:$0xff]  ;;  %v343_v48 = vsub.s32 0, %v342_v47 }
   0xc   :  { %161 = vperm.xlu1 %498, %v153_v9   ;;  %478 = vmatprep.mubr.msk.f32.mxu1 %vm164_vm2, %v150_v14  ;;  %v248_v39 = vld [vmem:[%s647_s5] sm:$0x3f]  ;;  %s524_s5 = smov [#allocation3]  }
   0xd   :  { %v334_v45 = vld [vmem:[%s649_s7] sm:$0x1]  ;;  %s430_s11 = sshll.u32 %s524_s5, 4  ;;  %s431_s11 = int_to_ptr.vmem [resolvable:$true] %s430_s11 }
   0xe   :  { %470 = vmatmul.mubr.msk.f32.gmra.mxu0 %vm57_vm0, %v38_v10  ;;  %156 = vperm.xlu0 %497, %v152_v11   ;;  %s499_s12 = scalar_lea.vmem %s431_s11, 16  ;;  %s503_s13 = scalar_lea.vmem %s431_s11, 32 }
   0xf   :  { %490 = vmatprep.mubr.msk.f32.mxu0 %vm522_vm1, %v521_v3  ;;  %p500_p0 = scmp.ne.s32.totalorder %s431_s11, %s499_s12  ;;  %p504_p1 = scmp.lt.s32.totalorder %s431_s11, %s431_s11 }
  0x10   :  { %252 = vperm.xlu1 %498, %v249_v12   ;;  %p505_p2 = scmp.lt.s32.totalorder %s503_s13, %s499_s12 }
  0x12   :  { %338 = vperm.xlu0 %497, %v335_v13   ;;  %p506_p3 = por %p505_p2, %p504_p1 }
  0x14   :  { %p507_p4 = pnand %p506_p3, %p500_p0 }
  0x81   :  { %v55_v16 = vpop.permute.xlu0 %54 }
  0x83   :  { %v45_v20 = vpop.permute.xlu1 %44 }
  0x85   :  { %v50_v21 = vpop.permute.xlu0 %49 }
  0x87   :  { %v162_v31 = vpop.permute.xlu1 %161 }
  0x89   :  { %v157_v34 = vpop.permute.xlu0 %156 }
  0x8b   :  { %v253_v40 = vpop.permute.xlu1 %252 }
  0x8d   :  { %v339_v49 = vpop.permute.xlu0 %338 }
  0x8e   :  { %v344_v50 = vrot.slane %v339_v49, %v343_v48 }
  0xc6   :  { %v133_v15 = vpop.f32.mrf.mxu0 }
  0xc7   :  { %v134_v26 = vadd.f32 %v133_v15, %v45_v20 }
  0xc8   :  { %v465_v17 = vpop.f32.mrf.mxu0 }
  0xc9   :  { %v147_v29 = vmax.f32 %v134_v26, 0.0 }
  0xca   :  { %v138_v18 = vpop.f32.mrf.mxu0 }
  0xcb   :  { %v139_v23 = vadd.f32 %v138_v18, %v50_v21 }
  0xcc   :  { %v468_v19 = vpop.f32.mrf.mxu0 }
  0xcd   :  { %v148_v28 = vmax.f32 %v139_v23, 0.0 }
  0xce   :  { %v143_v22 = vpop.f32.mrf.mxu0 }
  0xcf   :  { %v144_v24 = vadd.f32 %v143_v22, %v55_v16 }
  0xd0   :  { %v471_v25 = vpop.f32.mrf.mxu0 }
  0xd1   :  { %v149_v27 = vmax.f32 %v144_v24, 0.0 }
  0xd3   :  { %472 = vmatprep.subr.mxu1 %v149_v27 }
  0xd4   :  { %473 = vmatpush3.msra.mxu1 %v149_v27 }
  0xd5   :  { %474 = vmatprep.subr.mxu1 %v148_v28 }
  0xd6   :  { %475 = vmatpush3.msra.mxu1 %v148_v28 }
  0xd7   :  { %476 = vmatprep.subr.mxu1 %v147_v29 }
  0xd8   :  { %477 = vmatpush3.msra.mxu1 %v147_v29 }
  0xd9   :  { %479 = vmatmul.mubr.msk.f32.vlgmr.msra.gmra.mxu1 %vm164_vm2, %v151_v30  ;;  %481 = vmatprep.subr.mxu1 %v521_v3 }
  0xda   :  { %485 = vmatprep.mubr.msk.f32.mxu1 %vm522_vm1, %v521_v3 }
 0x199   :  { %v480_v32 = vpop.f32.mrf.mxu1 }
 0x19a   :  { %v243_v33 = vadd.f32 %v480_v32, %v162_v31 }
 0x19b   :  { %v237_v35 = vpop.f32.mrf.mxu1 }
 0x19c   :  { %v247_v36 = vmax.f32 %v243_v33, 0.0  ;;  %v238_v37 = vadd.f32 %v237_v35, %v157_v34 }
 0x19e   :  { %v246_v38 = vmax.f32 %v238_v37, 0.0  ;;  %482 = vmatpush3.msk.msra.mxu1 %vm259_vm3, %v247_v36 }
 0x19f   :  { %483 = vmatprep.subr.mxu1 %v521_v3 }
 0x1a0   :  { %484 = vmatpush3.msra.mxu1 %v246_v38 }
 0x1a1   :  { %486 = vmatmul.mubr.msk.f32.vlgmr.msra.gmra.mxu1 %vm255_vm4, %v248_v39 }
 0x261   :  { %v329_v41 = vpop.f32.mrf.mxu1 }
 0x262   :  { %v330_v42 = vadd.f32 %v329_v41, %v253_v40 }
 0x263   :  { %v487_v43 = vpop.f32.mrf.mxu1 }
 0x264   :  { %v333_v44 = vmax.f32 %v330_v42, 0.0 }
 0x266   :  { %489 = vmatpush3.msk.msra.mxu0 %vm349_vm5, %v333_v44 }
 0x267   :  { %491 = vmatmul.mubr.msk.f32.vlgmr.msra.gmra.mxu0 %vm345_vm6, %v334_v45 }
 0x327   :  { %v419_v51 = vpop.f32.mrf.mxu0 }
 0x328   :  { %v420_v52 = vadd.f32 %v419_v51, %v344_v50 }
 0x329   :  { %v492_v53 = vpop.f32.mrf.mxu0 }
 0x32a   :  { %423 = vst [vmem:[#allocation3] sm:$0x1] %v420_v52 }
 0x32b   :  { %510 = shalt.err (!%p507_p4)
}
 0x32c   :  { %433 = dma.vmem_to_hbm [thread:$0]  %s431_s11, 16, %s651_s9, [#allocation4]  }
 0x32d   :  { %519 = dma.done.wait [#allocation4], 16  }
 0x32e   :  { %520 = vsyncadd [#allocation4], 4294967280 }
 0x32f   :  { %437 = vsyncpa [#allocation4], 1 }

</bundles_post_ra>
